<compile_context>
chip_gen: v6e
topology: v6e:2x2x1
jax: 0.10.0
libtpu: 0.0.40
codegen_flags: <defaults>
</compile_context>

<pallas_src>
import functools

import jax
import jax.numpy as jnp
from jax.experimental import pallas as pl
from jax.experimental.pallas import tpu as pltpu

BN_EPS = 1e-5
LANE = 128
SUBLANE = 8


def _round_up(x, m):
    return ((x + m - 1) // m) * m


# ---------------------------------------------------------------------------
# Fused Pallas kernel: all residual blocks + final linear, activation kept in
# registers/VMEM for the whole network.
# ---------------------------------------------------------------------------
def metricnet_kernel(x_ref, w1_ref, b1_ref, w2_ref, b2_ref, wl_ref, bl_ref,
                     o_ref, *, num_blocks):
    x = x_ref[...].astype(jnp.float32)            # [TN, Dp] activation, f32
    for i in range(num_blocks):                   # static unroll over blocks
        # fc1 (+ folded bn1) + ReLU  -- bf16 MXU inputs, f32 accumulation
        h = jnp.dot(x.astype(jnp.bfloat16), w1_ref[i],
                    preferred_element_type=jnp.float32) + b1_ref[i]
        h = jnp.maximum(h, 0.0)
        # TODO(synk): training-mode stochastic dropout (rejection-resampled mask)
        #             not implemented; eval mode is identity.
        # fc2 (+ folded bn2) + residual + ReLU
        y = jnp.dot(h.astype(jnp.bfloat16), w2_ref[i],
                    preferred_element_type=jnp.float32) + b2_ref[i]
        x = jnp.maximum(y + x, 0.0)
    # final Linear
    out = jnp.dot(x.astype(jnp.bfloat16), wl_ref[...],
                  preferred_element_type=jnp.float32) + bl_ref[...]
    o_ref[...] = out.astype(o_ref.dtype)


# ---------------------------------------------------------------------------
# Forward wrapper (jitted). Pads batch/features, launches one pallas_call with
# a parallel batch grid, slices out the valid region.
# ---------------------------------------------------------------------------
@functools.partial(jax.jit, static_argnames=("num_blocks", "out_features"))
def metricnet_forward(x, fused, *, num_blocks, out_features):
    N, D = x.shape
    Dp = fused["w1"].shape[1]
    Op = fused["wl"].shape[1]

    TN = min(128, _round_up(N, SUBLANE))          # batch tile (multiple of 8)
    Npad = _round_up(N, TN)
    xp = jnp.zeros((Npad, Dp), jnp.float32).at[:N, :D].set(x)

    kernel = functools.partial(metricnet_kernel, num_blocks=num_blocks)
    out = pl.pallas_call(
        kernel,
        out_shape=jax.ShapeDtypeStruct((Npad, Op), jnp.float32),
        grid=(Npad // TN,),
        in_specs=[
            pl.BlockSpec((TN, Dp), lambda n: (n, 0)),                 # x tile
            pl.BlockSpec(fused["w1"].shape, lambda n: (0, 0, 0)),     # stacked W1
            pl.BlockSpec(fused["b1"].shape, lambda n: (0, 0, 0)),     # stacked b1
            pl.BlockSpec(fused["w2"].shape, lambda n: (0, 0, 0)),     # stacked W2
            pl.BlockSpec(fused["b2"].shape, lambda n: (0, 0, 0)),     # stacked b2
            pl.BlockSpec(fused["wl"].shape, lambda n: (0, 0)),        # W_last
            pl.BlockSpec(fused["bl"].shape, lambda n: (0, 0)),        # b_last
        ],
        out_specs=pl.BlockSpec((TN, Op), lambda n: (n, 0)),
        compiler_params=pltpu.CompilerParams(
            dimension_semantics=("parallel",)),
    )(xp, fused["w1"], fused["b1"], fused["w2"], fused["b2"],
      fused["wl"], fused["bl"])
    return out[:N, :out_features]


# ---------------------------------------------------------------------------
# Parameter init (mirrors the PyTorch __init__ shapes/inits)
# ---------------------------------------------------------------------------
def kaiming_normal(key, out_f, in_f):
    # nn.init.kaiming_normal_ default: fan_in, gain=sqrt(2) -> std = sqrt(2/fan_in)
    return jax.random.normal(key, (out_f, in_f), jnp.float32) * jnp.sqrt(2.0 / in_f)


def linear_bias(key, out_f, in_f):
    bound = 1.0 / jnp.sqrt(in_f)
    return jax.random.uniform(key, (out_f,), jnp.float32, -bound, bound)


def init_metricnet(key, input_size, output_size, block_pattern):
    # The residual add (out += residual) only type-checks when every
    # block_pattern entry equals input_size (inherited from the PyTorch model).
    for h in block_pattern:
        assert h == input_size, (
            f"block_pattern entry {h} != input_size {input_size}: "
            "ResidualBlock residual add would be shape-mismatched.")
    params = {"blocks": []}
    in_size = input_size
    for hidden in block_pattern:
        key, k1, k2, k3, k4 = jax.random.split(key, 5)
        blk = {
            "w1": kaiming_normal(k1, hidden, in_size),   # fc1.weight [H, D]
            "b1": linear_bias(k2, hidden, in_size),
            "w2": kaiming_normal(k3, in_size, hidden),   # fc2.weight [D, H]
            "b2": linear_bias(k4, in_size, hidden),
            # BatchNorm1d eval-mode buffers (defaults): gamma, beta, mean, var
            "bn1": (jnp.ones(hidden), jnp.zeros(hidden),
                    jnp.zeros(hidden), jnp.ones(hidden)),
            "bn2": (jnp.ones(in_size), jnp.zeros(in_size),
                    jnp.zeros(in_size), jnp.ones(in_size)),
        }
        params["blocks"].append(blk)
        in_size = hidden
    key, kw, kb = jax.random.split(key, 3)
    params["w_last"] = kaiming_normal(kw, output_size, in_size)  # [O, H]
    params["b_last"] = linear_bias(kb, output_size, in_size)
    return params


def fold_bn(bn, enabled):
    gamma, beta, mean, var = bn
    if not enabled:
        return jnp.ones_like(gamma), jnp.zeros_like(gamma)
    scale = gamma / jnp.sqrt(var + BN_EPS)
    shift = beta - mean * scale
    return scale, shift


def prepare_fused_params(params, input_size, output_size, batch_norm=True):
    """One-time host-side prep: transpose to [in,out], fold BN into W/b,
    pad to lane-dense shapes, stack per-block, cast weights to bf16."""
    blocks = params["blocks"]
    nb = len(blocks)
    D = input_size
    Dp = _round_up(D, LANE)
    Op = _round_up(output_size, LANE)

    w1s = jnp.zeros((nb, Dp, Dp), jnp.float32)
    b1s = jnp.zeros((nb, 1, Dp), jnp.float32)
    w2s = jnp.zeros((nb, Dp, Dp), jnp.float32)
    b2s = jnp.zeros((nb, 1, Dp), jnp.float32)
    for i, blk in enumerate(blocks):
        s1, t1 = fold_bn(blk["bn1"], batch_norm)
        s2, t2 = fold_bn(blk["bn2"], batch_norm)
        # y = bn(xW^T + b) = x (W^T * s) + (b*s + t)
        w1 = blk["w1"].T * s1[None, :]            # [D, H]
        b1 = blk["b1"] * s1 + t1
        w2 = blk["w2"].T * s2[None, :]            # [H, D]
        b2 = blk["b2"] * s2 + t2
        w1s = w1s.at[i, :w1.shape[0], :w1.shape[1]].set(w1)
        b1s = b1s.at[i, 0, :b1.shape[0]].set(b1)
        w2s = w2s.at[i, :w2.shape[0], :w2.shape[1]].set(w2)
        b2s = b2s.at[i, 0, :b2.shape[0]].set(b2)

    wl_t = params["w_last"].T                     # [H, O]
    wl = jnp.zeros((Dp, Op), jnp.float32).at[:wl_t.shape[0], :wl_t.shape[1]].set(wl_t)
    bl = jnp.zeros((1, Op), jnp.float32).at[0, :output_size].set(params["b_last"])

    return {
        "w1": w1s.astype(jnp.bfloat16), "b1": b1s,
        "w2": w2s.astype(jnp.bfloat16), "b2": b2s,
        "wl": wl.astype(jnp.bfloat16), "bl": bl,
    }


# ---------------------------------------------------------------------------
# Pure-JAX reference (f32 everywhere) for a sanity check
# ---------------------------------------------------------------------------
def metricnet_reference(x, params, batch_norm=True):
    for blk in params["blocks"]:
        s1, t1 = fold_bn(blk["bn1"], batch_norm)
        s2, t2 = fold_bn(blk["bn2"], batch_norm)
        h = x @ blk["w1"].T + blk["b1"]
        h = jnp.maximum(h * s1 + t1, 0.0)
        y = h @ blk["w2"].T + blk["b2"]
        y = y * s2 + t2
        x = jnp.maximum(y + x, 0.0)
    return x @ params["w_last"].T + params["b_last"]


if __name__ == "__main__":
    # Small config consistent with the module (all block_pattern entries must
    # equal input_size for the residual add to type-check).
    batch = 8
    input_size = 32
    output_size = 4
    block_pattern = [32, 32]

    key = jax.random.PRNGKey(0)
    key, kx = jax.random.split(key)
    x = jax.random.normal(kx, (batch, input_size), jnp.float32)

    params = init_metricnet(key, input_size, output_size, block_pattern)
    fused = prepare_fused_params(params, input_size, output_size, batch_norm=True)

    out = metricnet_forward(x, fused,
                            num_blocks=len(block_pattern),
                            out_features=output_size)
    jax.block_until_ready(out)
    assert out.shape == (batch, output_size)

    # Numerical sanity vs. f32 reference (relaxed tolerance: bf16 MXU inputs).
    ref = metricnet_reference(x, params, batch_norm=True)
    assert jnp.allclose(out, ref, rtol=5e-2, atol=5e-2), (
        float(jnp.max(jnp.abs(out - ref))))

    print("KERNEL_OK")
</pallas_src>

<mosaic_0001>
module attributes {stable_mosaic.version = 11 : i64} {
  func.func @metricnet_kernel(%arg0: i32, %arg1: memref<8x128xf32, #tpu.memory_space<vmem>>, %arg2: memref<2x128x128xbf16, #tpu.memory_space<vmem>>, %arg3: memref<2x1x128xf32, #tpu.memory_space<vmem>>, %arg4: memref<2x128x128xbf16, #tpu.memory_space<vmem>>, %arg5: memref<2x1x128xf32, #tpu.memory_space<vmem>>, %arg6: memref<128x128xbf16, #tpu.memory_space<vmem>>, %arg7: memref<1x128xf32, #tpu.memory_space<vmem>>, %arg8: memref<8x128xf32, #tpu.memory_space<vmem>>) attributes {dimension_semantics = [#tpu.dimension_semantics<parallel>], iteration_bounds = array<i64: 1>, scalar_prefetch = 0 : i64, scratch_operands = 0 : i64, tpu.core_type = #tpu.core_type<tc>, window_params = [{transform_indices = @transform_0, window_bounds = array<i64: 8, 128>}, {pipeline_mode = #tpu.pipeline_mode<synchronous>, transform_indices = @transform_1, window_bounds = array<i64: 2, 128, 128>}, {pipeline_mode = #tpu.pipeline_mode<synchronous>, transform_indices = @transform_2, window_bounds = array<i64: 2, 1, 128>}, {pipeline_mode = #tpu.pipeline_mode<synchronous>, transform_indices = @transform_3, window_bounds = array<i64: 2, 128, 128>}, {pipeline_mode = #tpu.pipeline_mode<synchronous>, transform_indices = @transform_4, window_bounds = array<i64: 2, 1, 128>}, {pipeline_mode = #tpu.pipeline_mode<synchronous>, transform_indices = @transform_5, window_bounds = array<i64: 128, 128>}, {pipeline_mode = #tpu.pipeline_mode<synchronous>, transform_indices = @transform_6, window_bounds = array<i64: 1, 128>}, {transform_indices = @transform_7, window_bounds = array<i64: 8, 128>}]} {
    %c0 = arith.constant 0 : index
    %c0_0 = arith.constant 0 : index
    %0 = vector.load %arg1[%c0, %c0_0] : memref<8x128xf32, #tpu.memory_space<vmem>>, vector<8x128xf32>
    %1 = arith.truncf %0 : vector<8x128xf32> to vector<8x128xbf16>
    %c0_1 = arith.constant 0 : index
    %c0_2 = arith.constant 0 : index
    %c0_3 = arith.constant 0 : index
    %2 = vector.load %arg2[%c0_1, %c0_2, %c0_3] : memref<2x128x128xbf16, #tpu.memory_space<vmem>>, vector<1x128x128xbf16>
    %3 = vector.shape_cast %2 : vector<1x128x128xbf16> to vector<128x128xbf16>
    %cst = arith.constant dense<0.000000e+00> : vector<8x128xf32>
    %4 = tpu.matmul %1, %3, %cst {dimension_numbers = #tpu.dot_dimension_numbers<[1], [0], [0], [1], [0, 0, 1, 1], [], []>} : vector<8x128xbf16>, vector<128x128xbf16>, vector<8x128xf32> -> vector<8x128xf32>
    %c0_4 = arith.constant 0 : index
    %c0_5 = arith.constant 0 : index
    %c0_6 = arith.constant 0 : index
    %5 = vector.load %arg3[%c0_4, %c0_5, %c0_6] : memref<2x1x128xf32, #tpu.memory_space<vmem>>, vector<1x1x128xf32>
    %6 = vector.shape_cast %5 : vector<1x1x128xf32> to vector<1x128xf32>
    %7 = vector.broadcast %6 : vector<1x128xf32> to vector<8x128xf32>
    %8 = arith.addf %4, %7 : vector<8x128xf32>
    %cst_7 = arith.constant 0.000000e+00 : f32
    %9 = vector.broadcast %cst_7 : f32 to vector<8x128xf32>
    %10 = arith.maximumf %8, %9 : vector<8x128xf32>
    %11 = arith.truncf %10 : vector<8x128xf32> to vector<8x128xbf16>
    %c0_8 = arith.constant 0 : index
    %c0_9 = arith.constant 0 : index
    %c0_10 = arith.constant 0 : index
    %12 = vector.load %arg4[%c0_8, %c0_9, %c0_10] : memref<2x128x128xbf16, #tpu.memory_space<vmem>>, vector<1x128x128xbf16>
    %13 = vector.shape_cast %12 : vector<1x128x128xbf16> to vector<128x128xbf16>
    %cst_11 = arith.constant dense<0.000000e+00> : vector<8x128xf32>
    %14 = tpu.matmul %11, %13, %cst_11 {dimension_numbers = #tpu.dot_dimension_numbers<[1], [0], [0], [1], [0, 0, 1, 1], [], []>} : vector<8x128xbf16>, vector<128x128xbf16>, vector<8x128xf32> -> vector<8x128xf32>
    %c0_12 = arith.constant 0 : index
    %c0_13 = arith.constant 0 : index
    %c0_14 = arith.constant 0 : index
    %15 = vector.load %arg5[%c0_12, %c0_13, %c0_14] : memref<2x1x128xf32, #tpu.memory_space<vmem>>, vector<1x1x128xf32>
    %16 = vector.shape_cast %15 : vector<1x1x128xf32> to vector<1x128xf32>
    %17 = vector.broadcast %16 : vector<1x128xf32> to vector<8x128xf32>
    %18 = arith.addf %14, %17 : vector<8x128xf32>
    %19 = arith.addf %18, %0 : vector<8x128xf32>
    %cst_15 = arith.constant 0.000000e+00 : f32
    %20 = vector.broadcast %cst_15 : f32 to vector<8x128xf32>
    %21 = arith.maximumf %19, %20 : vector<8x128xf32>
    %22 = arith.truncf %21 : vector<8x128xf32> to vector<8x128xbf16>
    %c1 = arith.constant 1 : index
    %c0_16 = arith.constant 0 : index
    %c0_17 = arith.constant 0 : index
    %23 = vector.load %arg2[%c1, %c0_16, %c0_17] : memref<2x128x128xbf16, #tpu.memory_space<vmem>>, vector<1x128x128xbf16>
    %24 = vector.shape_cast %23 : vector<1x128x128xbf16> to vector<128x128xbf16>
    %cst_18 = arith.constant dense<0.000000e+00> : vector<8x128xf32>
    %25 = tpu.matmul %22, %24, %cst_18 {dimension_numbers = #tpu.dot_dimension_numbers<[1], [0], [0], [1], [0, 0, 1, 1], [], []>} : vector<8x128xbf16>, vector<128x128xbf16>, vector<8x128xf32> -> vector<8x128xf32>
    %c1_19 = arith.constant 1 : index
    %c0_20 = arith.constant 0 : index
    %c0_21 = arith.constant 0 : index
    %26 = vector.load %arg3[%c1_19, %c0_20, %c0_21] : memref<2x1x128xf32, #tpu.memory_space<vmem>>, vector<1x1x128xf32>
    %27 = vector.shape_cast %26 : vector<1x1x128xf32> to vector<1x128xf32>
    %28 = vector.broadcast %27 : vector<1x128xf32> to vector<8x128xf32>
    %29 = arith.addf %25, %28 : vector<8x128xf32>
    %cst_22 = arith.constant 0.000000e+00 : f32
    %30 = vector.broadcast %cst_22 : f32 to vector<8x128xf32>
    %31 = arith.maximumf %29, %30 : vector<8x128xf32>
    %32 = arith.truncf %31 : vector<8x128xf32> to vector<8x128xbf16>
    %c1_23 = arith.constant 1 : index
    %c0_24 = arith.constant 0 : index
    %c0_25 = arith.constant 0 : index
    %33 = vector.load %arg4[%c1_23, %c0_24, %c0_25] : memref<2x128x128xbf16, #tpu.memory_space<vmem>>, vector<1x128x128xbf16>
    %34 = vector.shape_cast %33 : vector<1x128x128xbf16> to vector<128x128xbf16>
    %cst_26 = arith.constant dense<0.000000e+00> : vector<8x128xf32>
    %35 = tpu.matmul %32, %34, %cst_26 {dimension_numbers = #tpu.dot_dimension_numbers<[1], [0], [0], [1], [0, 0, 1, 1], [], []>} : vector<8x128xbf16>, vector<128x128xbf16>, vector<8x128xf32> -> vector<8x128xf32>
    %c1_27 = arith.constant 1 : index
    %c0_28 = arith.constant 0 : index
    %c0_29 = arith.constant 0 : index
    %36 = vector.load %arg5[%c1_27, %c0_28, %c0_29] : memref<2x1x128xf32, #tpu.memory_space<vmem>>, vector<1x1x128xf32>
    %37 = vector.shape_cast %36 : vector<1x1x128xf32> to vector<1x128xf32>
    %38 = vector.broadcast %37 : vector<1x128xf32> to vector<8x128xf32>
    %39 = arith.addf %35, %38 : vector<8x128xf32>
    %40 = arith.addf %39, %21 : vector<8x128xf32>
    %cst_30 = arith.constant 0.000000e+00 : f32
    %41 = vector.broadcast %cst_30 : f32 to vector<8x128xf32>
    %42 = arith.maximumf %40, %41 : vector<8x128xf32>
    %43 = arith.truncf %42 : vector<8x128xf32> to vector<8x128xbf16>
    %c0_31 = arith.constant 0 : index
    %c0_32 = arith.constant 0 : index
    %44 = vector.load %arg6[%c0_31, %c0_32] : memref<128x128xbf16, #tpu.memory_space<vmem>>, vector<128x128xbf16>
    %cst_33 = arith.constant dense<0.000000e+00> : vector<8x128xf32>
    %45 = tpu.matmul %43, %44, %cst_33 {dimension_numbers = #tpu.dot_dimension_numbers<[1], [0], [0], [1], [0, 0, 1, 1], [], []>} : vector<8x128xbf16>, vector<128x128xbf16>, vector<8x128xf32> -> vector<8x128xf32>
    %c0_34 = arith.constant 0 : index
    %c0_35 = arith.constant 0 : index
    %46 = vector.load %arg7[%c0_34, %c0_35] : memref<1x128xf32, #tpu.memory_space<vmem>>, vector<1x128xf32>
    %47 = vector.broadcast %46 : vector<1x128xf32> to vector<8x128xf32>
    %48 = arith.addf %45, %47 : vector<8x128xf32>
    %c0_36 = arith.constant 0 : index
    %c0_37 = arith.constant 0 : index
    %49 = vector.load %arg8[%c0_36, %c0_37] : memref<8x128xf32, #tpu.memory_space<vmem>>, vector<8x128xf32>
    tpu.vector_store %arg8[%c0_36, %c0_37], %48 {strides = array<i32>} : memref<8x128xf32, #tpu.memory_space<vmem>>, vector<8x128xf32>,
    return
  }
  func.func @transform_0(%arg0: i32) -> (i32, i32) {
    %c0_i32 = arith.constant 0 : i32
    %c0_i32_0 = arith.constant 0 : i32
    return %arg0, %c0_i32 : i32, i32
  }
  func.func @transform_1(%arg0: i32) -> (i32, i32, i32) {
    %c0_i32 = arith.constant 0 : i32
    %c0_i32_0 = arith.constant 0 : i32
    %c0_i32_1 = arith.constant 0 : i32
    %c0_i32_2 = arith.constant 0 : i32
    return %c0_i32, %c0_i32_0, %c0_i32_1 : i32, i32, i32
  }
  func.func @transform_2(%arg0: i32) -> (i32, i32, i32) {
    %c0_i32 = arith.constant 0 : i32
    %c0_i32_0 = arith.constant 0 : i32
    %c0_i32_1 = arith.constant 0 : i32
    %c0_i32_2 = arith.constant 0 : i32
    return %c0_i32, %c0_i32_0, %c0_i32_1 : i32, i32, i32
  }
  func.func @transform_3(%arg0: i32) -> (i32, i32, i32) {
    %c0_i32 = arith.constant 0 : i32
    %c0_i32_0 = arith.constant 0 : i32
    %c0_i32_1 = arith.constant 0 : i32
    %c0_i32_2 = arith.constant 0 : i32
    return %c0_i32, %c0_i32_0, %c0_i32_1 : i32, i32, i32
  }
  func.func @transform_4(%arg0: i32) -> (i32, i32, i32) {
    %c0_i32 = arith.constant 0 : i32
    %c0_i32_0 = arith.constant 0 : i32
    %c0_i32_1 = arith.constant 0 : i32
    %c0_i32_2 = arith.constant 0 : i32
    return %c0_i32, %c0_i32_0, %c0_i32_1 : i32, i32, i32
  }
  func.func @transform_5(%arg0: i32) -> (i32, i32) {
    %c0_i32 = arith.constant 0 : i32
    %c0_i32_0 = arith.constant 0 : i32
    %c0_i32_1 = arith.constant 0 : i32
    return %c0_i32, %c0_i32_0 : i32, i32
  }
  func.func @transform_6(%arg0: i32) -> (i32, i32) {
    %c0_i32 = arith.constant 0 : i32
    %c0_i32_0 = arith.constant 0 : i32
    %c0_i32_1 = arith.constant 0 : i32
    return %c0_i32, %c0_i32_0 : i32, i32
  }
  func.func @transform_7(%arg0: i32) -> (i32, i32) {
    %c0_i32 = arith.constant 0 : i32
    %c0_i32_0 = arith.constant 0 : i32
    return %arg0, %c0_i32 : i32, i32
  }
}

</mosaic_0001>

<bundles_post_ra>
// kernel: metricnet_forward.1
= control target key start
LH: loop header
LB: loop body
LE: loop exit
PB: predicated region body
PF: predicated region fallthrough
CT: control target
= control target key end

     0   :  { %12 = vsyncpa [#allocation3], 0  ;;  %s1081_s0 = inlined_call_operand.vmem [shape: f32[8,128], index: 0, kind: input, shape index: {}]   ;;  %s1082_s1 = inlined_call_operand.hbm [shape: bf16[2,128,128], index: 1, kind: input, shape index: {}]   ;;  %s1083_s2 = inlined_call_operand.vmem [shape: f32[2,1,128], index: 2, kind: input, shape index: {}]   ;;  %s1084_s3 = inlined_call_operand.hbm [shape: bf16[2,128,128], index: 3, kind: input, shape index: {}]   ;;  %s1085_s4 = inlined_call_operand.vmem [shape: f32[2,1,128], index: 4, kind: input, shape index: {}]   ;;  %s1086_s5 = inlined_call_operand.hbm [shape: bf16[128,128], index: 5, kind: input, shape index: {}]   ;;  %s1087_s6 = inlined_call_operand.vmem [shape: f32[1,128], index: 6, kind: input, shape index: {}]   ;;  %s1088_s7 = inlined_call_operand.vmem [shape: f32[8,128], index: 7, kind: output, shape index: {}]  }
   0x1   :  { %13 = vsyncpa [#allocation5], 0  ;;  %s949_s24 = smov [#allocation4]   ;;  %s950_s26 = smov [#allocation2]  }
   0x2   :  { %s35_s25 = sshll.u32 %s949_s24, 4  ;;  %s21_s27 = sshll.u32 %s950_s26, 4  ;;  %s36_s25 = int_to_ptr.vmem [resolvable:$true] %s35_s25  ;;  %s22_s27 = int_to_ptr.vmem [resolvable:$true] %s21_s27 }
   0x3   :  { %s893_s28 = scalar_lea.vmem %s36_s25, 2048  ;;  %p898_p1 = scmp.lt.s32.totalorder %s36_s25, %s36_s25 }
   0x4   :  { %p894_p0 = scmp.ne.s32.totalorder %s36_s25, %s893_s28  ;;  %p899_p2 = scmp.lt.s32.totalorder %s893_s28, %s893_s28 }
   0x6   :  { %p900_p3 = por %p899_p2, %p898_p1 }
   0x8   :  { %p901_p4 = pnand %p900_p3, %p894_p0 }
   0xa   :  { %904 = shalt.err (!%p901_p4)
}
   0xb   :  { %s951_s29 = smov 64   ;;  %s952_s30 = smov 4  }
   0xc   :  { %41 = dma.hbm_to_vmem [thread:$0]  %s1084_s3, 2048, %s36_s25, [#allocation5], %s951_s29, %s951_s29, %s952_s30  }
   0xd   :  { %s913_s10 = scalar_lea.vmem %s22_s27, 2048  ;;  %p918_p6 = scmp.lt.s32.totalorder %s22_s27, %s22_s27 }
   0xe   :  { %p914_p5 = scmp.ne.s32.totalorder %s22_s27, %s913_s10  ;;  %p919_p7 = scmp.lt.s32.totalorder %s913_s10, %s913_s10 }
  0x10   :  { %p920_p8 = por %p919_p7, %p918_p6 }
  0x12   :  { %p921_p9 = pnand %p920_p8, %p914_p5 }
  0x14   :  { %924 = shalt.err (!%p921_p9)
}
  0x15   :  { %27 = dma.hbm_to_vmem [thread:$0]  %s1082_s1, 2048, %s22_s27, [#allocation3], %s951_s29, %s951_s29, %s952_s30  }
  0x16   :  { %s953_s13 = smov [#allocation6]  }
  0x17   :  { %s49_s14 = sshll.u32 %s953_s13, 4  ;;  %s50_s14 = int_to_ptr.vmem [resolvable:$true] %s49_s14 }
  0x18   :  { %s933_s15 = scalar_lea.vmem %s50_s14, 1024  ;;  %p938_p11 = scmp.lt.s32.totalorder %s50_s14, %s50_s14 }
  0x19   :  { %p934_p10 = scmp.ne.s32.totalorder %s50_s14, %s933_s15  ;;  %p939_p12 = scmp.lt.s32.totalorder %s933_s15, %s933_s15 }
  0x1b   :  { %p940_p13 = por %p939_p12, %p938_p11 }
  0x1d   :  { %p941_p0 = pnand %p940_p13, %p934_p10 }
  0x1f   :  { %944 = shalt.err (!%p941_p0)
}
  0x20   :  { %55 = dma.hbm_to_vmem [thread:$0]  %s1086_s5, 1024, %s50_s14, [#allocation5], %s951_s29, %s951_s29, %s952_s30  }
  0x21   :  { %945 = dma.done.wait [#allocation3], 2048  }
  0x22   :  { %946 = vsyncadd [#allocation3], 4294965248 }
  0x23   :  { %947 = dma.done.wait [#allocation5], 3072  }
  0x24   :  { %948 = vsyncadd [#allocation5], 4294964224  ;;  %v954_v0 = vmov 0.0   ;;  %vm955_vm0 = vmmov 0   ;;  %v845_v1 = vld [vmem:[#allocation2 + $0x38] sm:$0xff]   ;;  %v846_v2 = vld [vmem:[#allocation2 + $0x30] sm:$0xff]  }
  0x25   :  { %738 = vmatprep.subr.bf16.mxu0 %v954_v0  ;;  %754 = vmatprep.mubr.msk.bf16.mxu0 %vm955_vm0, %v954_v0  ;;  %v847_v3 = vld [vmem:[#allocation2 + $0x28] sm:$0xff]   ;;  %v853_v4 = vld [vmem:[#allocation4 + $0x38] sm:$0xff]   ;;  %v848_v5 = vld [vmem:[#allocation2 + $0x20] sm:$0xff]  }
  0x26   :  { %758 = vmatprep.subr.bf16.mxu1 %v954_v0  ;;  %774 = vmatprep.mubr.msk.bf16.mxu1 %vm955_vm0, %v954_v0  ;;  %v854_v6 = vld [vmem:[#allocation4 + $0x30] sm:$0xff]   ;;  %v849_v7 = vld [vmem:[#allocation2 + $0x18] sm:$0xff]   ;;  %v855_v8 = vld [vmem:[#allocation4 + $0x28] sm:$0xff]  }
  0x27   :  { %739 = vmatpush3.bf16.msra.mxu0 %v845_v1  ;;  %759 = vmatpush3.bf16.msra.mxu1 %v853_v4  ;;  %v850_v9 = vld [vmem:[#allocation2 + $0x10] sm:$0xff]   ;;  %v856_v10 = vld [vmem:[#allocation4 + $0x20] sm:$0xff]   ;;  %v851_v11 = vld [vmem:[#allocation2 + $0x8] sm:$0xff]  }
  0x28   :  { %740 = vmatprep.subr.bf16.mxu0 %v954_v0  ;;  %760 = vmatprep.subr.bf16.mxu1 %v954_v0  ;;  %v857_v12 = vld [vmem:[#allocation4 + $0x18] sm:$0xff]   ;;  %v852_v13 = vld [vmem:[#allocation2] sm:$0xff]   ;;  %v858_v15 = vld [vmem:[#allocation4 + $0x10] sm:$0xff]  }
  0x29   :  { %v1023_v14 = vld [vmem:[%s1081_s0] sm:$0xff]  ;;  %v859_v17 = vld [vmem:[#allocation4 + $0x8] sm:$0xff]   ;;  %v861_v19 = vld [vmem:[#allocation2 + $0x78] sm:$0xff]  }
  0x2a   :  { %v69_v16 = vpack.c.bf16 %v1023_v14, %v1023_v14  ;;  %v860_v18 = vld [vmem:[#allocation4] sm:$0xff]   ;;  %v862_v20 = vld [vmem:[#allocation2 + $0x70] sm:$0xff]   ;;  %v863_v21 = vld [vmem:[#allocation2 + $0x68] sm:$0xff]  }
  0x2b   :  { %741 = vmatpush3.bf16.msra.mxu0 %v846_v2  ;;  %761 = vmatpush3.bf16.msra.mxu1 %v854_v6  ;;  %v864_v22 = vld [vmem:[#allocation2 + $0x60] sm:$0xff]   ;;  %v865_v23 = vld [vmem:[#allocation2 + $0x58] sm:$0xff]   ;;  %v866_v24 = vld [vmem:[#allocation2 + $0x50] sm:$0xff]  }
  0x2c   :  { %742 = vmatprep.subr.bf16.mxu0 %v954_v0  ;;  %762 = vmatprep.subr.bf16.mxu1 %v954_v0  ;;  %v646_v25 = vld [vmem:[%s1083_s2] ss:$0 sm:$0xff]  ;;  %v867_v33 = vld [vmem:[#allocation2 + $0x48] sm:$0xff]   ;;  %v869_v35 = vld [vmem:[#allocation4 + $0x78] sm:$0xff]  }
  0x2d   :  { %v868_v34 = vld [vmem:[#allocation2 + $0x40] sm:$0xff]   ;;  %v870_v36 = vld [vmem:[#allocation4 + $0x70] sm:$0xff]   ;;  %v871_v37 = vld [vmem:[#allocation4 + $0x68] sm:$0xff]  }
  0x2e   :  { %v872_v38 = vld [vmem:[#allocation4 + $0x60] sm:$0xff]   ;;  %v873_v39 = vld [vmem:[#allocation4 + $0x58] sm:$0xff]   ;;  %v874_v40 = vld [vmem:[#allocation4 + $0x50] sm:$0xff]  }
  0x2f   :  { %743 = vmatpush3.bf16.msra.mxu0 %v847_v3  ;;  %763 = vmatpush3.bf16.msra.mxu1 %v855_v8  ;;  %v655_v41 = vld [vmem:[%s1085_s4] ss:$0 sm:$0xff]  ;;  %v875_v50 = vld [vmem:[#allocation4 + $0x48] sm:$0xff]   ;;  %v877_v52 = vld [vmem:[#allocation6 + $0x38] sm:$0xff]  }
  0x30   :  { %744 = vmatprep.subr.bf16.mxu0 %v954_v0  ;;  %764 = vmatprep.subr.bf16.mxu1 %v954_v0  ;;  %v876_v51 = vld [vmem:[#allocation4 + $0x40] sm:$0xff]   ;;  %v878_v53 = vld [vmem:[#allocation6 + $0x30] sm:$0xff]   ;;  %v879_v54 = vld [vmem:[#allocation6 + $0x28] sm:$0xff]  }
  0x31   :  { %v880_v55 = vld [vmem:[#allocation6 + $0x20] sm:$0xff]   ;;  %v881_v56 = vld [vmem:[#allocation6 + $0x18] sm:$0xff]   ;;  %v882_v57 = vld [vmem:[#allocation6 + $0x10] sm:$0xff]  }
  0x32   :  { %v665_v58 = vld [vmem:[%s1083_s2 + $0x1] ss:$0 sm:$0xff]  ;;  %v883_v3 = vld [vmem:[#allocation6 + $0x8] sm:$0xff]  }
  0x33   :  { %745 = vmatpush3.bf16.msra.mxu0 %v848_v5  ;;  %765 = vmatpush3.bf16.msra.mxu1 %v856_v10  ;;  %v884_v4 = vld [vmem:[#allocation6] sm:$0xff]  }
  0x34   :  { %746 = vmatprep.subr.bf16.mxu0 %v954_v0  ;;  %766 = vmatprep.subr.bf16.mxu1 %v954_v0  ;;  %v675_v5 = vld [vmem:[%s1085_s4 + $0x1] ss:$0 sm:$0xff] }
  0x37   :  { %747 = vmatpush3.bf16.msra.mxu0 %v849_v7  ;;  %767 = vmatpush3.bf16.msra.mxu1 %v857_v12 }
  0x38   :  { %748 = vmatprep.subr.bf16.mxu0 %v954_v0  ;;  %768 = vmatprep.subr.bf16.mxu1 %v954_v0 }
  0x3b   :  { %749 = vmatpush3.bf16.msra.mxu0 %v850_v9  ;;  %769 = vmatpush3.bf16.msra.mxu1 %v858_v15 }
  0x3c   :  { %750 = vmatprep.subr.bf16.mxu0 %v954_v0  ;;  %770 = vmatprep.subr.bf16.mxu1 %v954_v0 }
  0x3f   :  { %751 = vmatpush3.bf16.msra.mxu0 %v851_v11  ;;  %771 = vmatpush3.bf16.msra.mxu1 %v859_v17 }
  0x40   :  { %752 = vmatprep.subr.bf16.mxu0 %v954_v0  ;;  %772 = vmatprep.subr.bf16.mxu1 %v954_v0 }
  0x43   :  { %753 = vmatpush3.bf16.msra.mxu0 %v852_v13  ;;  %773 = vmatpush3.bf16.msra.mxu1 %v860_v18 }
  0x44   :  { %778 = vmatprep.subr.bf16.mxu0 %v954_v0  ;;  %798 = vmatprep.subr.bf16.mxu1 %v954_v0 }
  0x46   :  { %755 = vmatmul.mubr.bf16.vlgmr.msra.gmra.mxu0 %v69_v16 }
  0x47   :  { %794 = vmatprep.mubr.msk.bf16.mxu0 %vm955_vm0, %v954_v0  ;;  %779 = vmatpush3.bf16.msra.mxu0 %v861_v19 }
  0x48   :  { %780 = vmatprep.subr.bf16.mxu0 %v954_v0 }
  0x4b   :  { %781 = vmatpush3.bf16.msra.mxu0 %v862_v20 }
  0x4c   :  { %782 = vmatprep.subr.bf16.mxu0 %v954_v0 }
  0x4f   :  { %783 = vmatpush3.bf16.msra.mxu0 %v863_v21 }
  0x50   :  { %784 = vmatprep.subr.bf16.mxu0 %v954_v0 }
  0x53   :  { %785 = vmatpush3.bf16.msra.mxu0 %v864_v22 }
  0x54   :  { %786 = vmatprep.subr.bf16.mxu0 %v954_v0 }
  0x57   :  { %787 = vmatpush3.bf16.msra.mxu0 %v865_v23 }
  0x58   :  { %788 = vmatprep.subr.bf16.mxu0 %v954_v0 }
  0x5b   :  { %789 = vmatpush3.bf16.msra.mxu0 %v866_v24 }
  0x5c   :  { %790 = vmatprep.subr.bf16.mxu0 %v954_v0 }
  0x5f   :  { %791 = vmatpush3.bf16.msra.mxu0 %v867_v33 }
  0x60   :  { %792 = vmatprep.subr.bf16.mxu0 %v954_v0 }
  0x63   :  { %793 = vmatpush3.bf16.msra.mxu0 %v868_v34 }
  0x64   :  { %818 = vmatprep.subr.bf16.mxu0 %v954_v0 }
 0x106   :  { %v175_v26 = vpop.f32.mrf.mxu0 }
 0x107   :  { %v176_v27 = vadd.f32 %v646_v25, %v175_v26 }
 0x108   :  { %v756_v28 = vpop.f32.mrf.mxu0 }
 0x109   :  { %v181_v29 = vmax.f32 %v176_v27, 0.0 }
 0x10a   :  { %v178_v30 = vpop.f32.mrf.mxu0 }
 0x10b   :  { %v182_v31 = vpack.c.bf16 %v181_v29, %v181_v29 }
 0x10c   :  { %v757_v32 = vpop.f32.mrf.mxu0 }
 0x10d   :  { %775 = vmatmul.mubr.bf16.vlgmr.msra.gmra.mxu1 %v182_v31 }
 0x10e   :  { %814 = vmatprep.mubr.msk.bf16.mxu1 %vm955_vm0, %v954_v0  ;;  %799 = vmatpush3.bf16.msra.mxu1 %v869_v35 }
 0x10f   :  { %800 = vmatprep.subr.bf16.mxu1 %v954_v0 }
 0x112   :  { %801 = vmatpush3.bf16.msra.mxu1 %v870_v36 }
 0x113   :  { %802 = vmatprep.subr.bf16.mxu1 %v954_v0 }
 0x116   :  { %803 = vmatpush3.bf16.msra.mxu1 %v871_v37 }
 0x117   :  { %804 = vmatprep.subr.bf16.mxu1 %v954_v0 }
 0x11a   :  { %805 = vmatpush3.bf16.msra.mxu1 %v872_v38 }
 0x11b   :  { %806 = vmatprep.subr.bf16.mxu1 %v954_v0 }
 0x11e   :  { %807 = vmatpush3.bf16.msra.mxu1 %v873_v39 }
 0x11f   :  { %808 = vmatprep.subr.bf16.mxu1 %v954_v0 }
 0x122   :  { %809 = vmatpush3.bf16.msra.mxu1 %v874_v40 }
 0x123   :  { %810 = vmatprep.subr.bf16.mxu1 %v954_v0 }
 0x126   :  { %811 = vmatpush3.bf16.msra.mxu1 %v875_v50 }
 0x127   :  { %812 = vmatprep.subr.bf16.mxu1 %v954_v0 }
 0x12a   :  { %813 = vmatpush3.bf16.msra.mxu1 %v876_v51 }
 0x1cd   :  { %v288_v42 = vpop.f32.mrf.mxu1 }
 0x1ce   :  { %v289_v43 = vadd.f32 %v655_v41, %v288_v42 }
 0x1cf   :  { %v776_v44 = vpop.f32.mrf.mxu1 }
 0x1d0   :  { %v294_v45 = vadd.f32 %v289_v43, %v1023_v14  ;;  %v684_v14 = vld [vmem:[%s1087_s6] ss:$0 sm:$0xff] }
 0x1d1   :  { %v291_v46 = vpop.f32.mrf.mxu1 }
 0x1d2   :  { %v295_v47 = vmax.f32 %v294_v45, 0.0 }
 0x1d3   :  { %v777_v48 = vpop.f32.mrf.mxu1 }
 0x1d4   :  { %v296_v49 = vpack.c.bf16 %v295_v47, %v295_v47 }
 0x1d6   :  { %795 = vmatmul.mubr.bf16.vlgmr.msra.gmra.mxu0 %v296_v49 }
 0x1d7   :  { %834 = vmatprep.mubr.msk.bf16.mxu0 %vm955_vm0, %v954_v0  ;;  %819 = vmatpush3.bf16.msra.mxu0 %v877_v52 }
 0x1d8   :  { %820 = vmatprep.subr.bf16.mxu0 %v954_v0 }
 0x1db   :  { %821 = vmatpush3.bf16.msra.mxu0 %v878_v53 }
 0x1dc   :  { %822 = vmatprep.subr.bf16.mxu0 %v954_v0 }
 0x1df   :  { %823 = vmatpush3.bf16.msra.mxu0 %v879_v54 }
 0x1e0   :  { %824 = vmatprep.subr.bf16.mxu0 %v954_v0 }
 0x1e3   :  { %825 = vmatpush3.bf16.msra.mxu0 %v880_v55 }
 0x1e4   :  { %826 = vmatprep.subr.bf16.mxu0 %v954_v0 }
 0x1e7   :  { %827 = vmatpush3.bf16.msra.mxu0 %v881_v56 }
 0x1e8   :  { %828 = vmatprep.subr.bf16.mxu0 %v954_v0 }
 0x1eb   :  { %829 = vmatpush3.bf16.msra.mxu0 %v882_v57 }
 0x1ec   :  { %830 = vmatprep.subr.bf16.mxu0 %v954_v0 }
 0x1ef   :  { %831 = vmatpush3.bf16.msra.mxu0 %v883_v3 }
 0x1f0   :  { %832 = vmatprep.subr.bf16.mxu0 %v954_v0 }
 0x1f3   :  { %833 = vmatpush3.bf16.msra.mxu0 %v884_v4 }
 0x296   :  { %v404_v59 = vpop.f32.mrf.mxu0 }
 0x297   :  { %v405_v60 = vadd.f32 %v665_v58, %v404_v59 }
 0x298   :  { %v796_v61 = vpop.f32.mrf.mxu0 }
 0x299   :  { %v410_v62 = vmax.f32 %v405_v60, 0.0 }
 0x29a   :  { %v407_v63 = vpop.f32.mrf.mxu0 }
 0x29b   :  { %v411_v1 = vpack.c.bf16 %v410_v62, %v410_v62 }
 0x29c   :  { %v797_v2 = vpop.f32.mrf.mxu0 }
 0x29d   :  { %815 = vmatmul.mubr.bf16.vlgmr.msra.gmra.mxu1 %v411_v1 }
 0x35d   :  { %v519_v6 = vpop.f32.mrf.mxu1 }
 0x35e   :  { %v520_v7 = vadd.f32 %v675_v5, %v519_v6 }
 0x35f   :  { %v816_v8 = vpop.f32.mrf.mxu1 }
 0x360   :  { %v525_v9 = vadd.f32 %v520_v7, %v295_v47 }
 0x361   :  { %v522_v10 = vpop.f32.mrf.mxu1 }
 0x362   :  { %v526_v11 = vmax.f32 %v525_v9, 0.0 }
 0x363   :  { %v817_v12 = vpop.f32.mrf.mxu1 }
 0x364   :  { %v527_v13 = vpack.c.bf16 %v526_v11, %v526_v11 }
 0x366   :  { %835 = vmatmul.mubr.bf16.vlgmr.msra.gmra.mxu0 %v527_v13 }
 0x426   :  { %v633_v0 = vpop.f32.mrf.mxu0 }
 0x427   :  { %v634_v15 = vadd.f32 %v684_v14, %v633_v0 }
 0x428   :  { %v836_v16 = vpop.f32.mrf.mxu0 }
 0x429   :  { %639 = vst [vmem:[%s1088_s7] sm:$0xff] %v634_v15 }
 0x42a   :  { %v636_v17 = vpop.f32.mrf.mxu0 }
 0x42c   :  { %v837_v18 = vpop.f32.mrf.mxu0 }
 0x42d   :  { %644 = vsyncpa [#allocation3], 1 }
 0x42e   :  { %645 = vsyncpa [#allocation5], 1 }

</bundles_post_ra>
